<compile_context>
chip_gen: v7x
topology: tpu7x:2x2x1
jax: 0.10.0
libtpu: 0.0.40
codegen_flags: <defaults>
</compile_context>

<pallas_src>
import jax
import jax.numpy as jnp
import numpy as np
from jax.experimental import pallas as pl
from jax.experimental.pallas import tpu as pltpu


# ----------------------------------------------------------------------------
# Kernel
# ----------------------------------------------------------------------------
def _sigmoid(z):
    # EUP-friendly sigmoid (tanh runs on the transcendental unit).
    return 0.5 * (jnp.tanh(0.5 * z) + 1.0)


def cbam_kernel(x_ref, w1_ref, b1_ref, w2_ref, b2_ref, m_ref, cb_ref, out_ref):
    # x_ref : (1, C, HW) VMEM   lane-dense sample (HW on lanes)
    # w1    : (Cr, C)  VMEM     b1 : (Cr, 1) VMEM
    # w2    : (C, Cr)  VMEM     b2 : (C, 1)  VMEM
    # m     : (2*HW, HW) VMEM   dense 7x7 "same"-conv matrix (avg rows | max rows)
    # cb    : (1,)     SMEM     conv bias
    x = x_ref[0].astype(jnp.float32)                         # (C, HW), f32 math
    C, HW = x.shape

    # ---------------- channel attention (channels on sublanes) ---------------
    avg_c = jnp.sum(x, axis=1, keepdims=True) * (1.0 / HW)   # (C, 1)
    max_c = jnp.max(x, axis=1, keepdims=True)                # (C, 1)
    pooled = jnp.concatenate([avg_c, max_c], axis=1)         # (C, 2)

    # One batched MLP pass for both pooled branches (2 dots instead of 4).
    h = jnp.dot(w1_ref[...], pooled,
                preferred_element_type=jnp.float32) + b1_ref[...]   # (Cr, 2)
    h = jnp.maximum(h, 0.0)
    o = jnp.dot(w2_ref[...], h,
                preferred_element_type=jnp.float32) + b2_ref[...]   # (C, 2)
    ca = _sigmoid(o[:, 0:1] + o[:, 1:2])                     # (C, 1)
    x_ca = x * ca                                            # (C, HW)

    # ---------------- spatial attention (conv as one MXU dot) ----------------
    avg_s = jnp.sum(x_ca, axis=0, keepdims=True) * (1.0 / C)  # (1, HW)
    max_s = jnp.max(x_ca, axis=0, keepdims=True)              # (1, HW)
    v = jnp.concatenate([avg_s, max_s], axis=1)                # (1, 2*HW)
    conv = jnp.dot(v, m_ref[...],
                   preferred_element_type=jnp.float32)         # (1, HW)
    sa = _sigmoid(conv + cb_ref[0])                            # (1, HW)

    out_ref[0] = (x_ca * sa).astype(out_ref.dtype)


# ----------------------------------------------------------------------------
# Conv-matrix construction (wrapper side)
# ----------------------------------------------------------------------------
def _offset_onehot(n, taps=7, pad=3):
    # basis[p, q, k] = 1.0 iff p - q + pad == k   (p: input pos, q: output pos)
    p = np.arange(n)[:, None, None]
    q = np.arange(n)[None, :, None]
    k = np.arange(taps)[None, None, :]
    return (p - q + pad == k).astype(np.float32)


def _build_conv_matrix(conv_w, H, W):
    """Dense M (2*HW, HW): for flattened maps v = [avg | max] (1, 2*HW),
    v @ M equals Conv2d(2->1, kernel=7, padding=3, bias=False) flattened."""
    HW = H * W
    a = jnp.asarray(_offset_onehot(H))                 # (H, H, 7) row offsets
    b = jnp.asarray(_offset_onehot(W))                 # (W, W, 7) col offsets
    w = conv_w.reshape(2, 7, 7).astype(jnp.float32)    # (in_chan, kh, kw)
    # M[c, pi, qi, pj, qj] = sum_{kh,kw} a[pi,qi,kh] * w[c,kh,kw] * b[pj,qj,kw]
    u = jnp.einsum('abh,chk->cabk', a, w)              # (2, H, H, 7)
    t = jnp.einsum('cabk,dek->cabde', u, b)            # (2, pi, qi, pj, qj)
    return t.transpose(0, 1, 3, 2, 4).reshape(2 * HW, HW)   # rows (c,pi,pj)


# ----------------------------------------------------------------------------
# Wrapper
# ----------------------------------------------------------------------------
@jax.jit
def cbam_forward(x, w1, b1, w2, b2, conv_w, conv_b):
    B, C, H, W = x.shape
    hidden = w1.shape[1]
    HW = H * W

    # Lane-dense layout + transposed MLP params so channels live on sublanes.
    x_flat = x.reshape(B, C, HW)
    w1t = jnp.transpose(w1)                 # (hidden, C)
    b1c = jnp.reshape(b1, (hidden, 1))
    w2t = jnp.transpose(w2)                 # (C, hidden)
    b2c = jnp.reshape(b2, (C, 1))
    conv_mat = _build_conv_matrix(conv_w, H, W)   # (2*HW, HW) f32

    out_flat = pl.pallas_call(
        cbam_kernel,
        out_shape=jax.ShapeDtypeStruct((B, C, HW), x.dtype),
        grid_spec=pltpu.PrefetchScalarGridSpec(
            num_scalar_prefetch=0,
            grid=(B,),
            in_specs=[
                pl.BlockSpec((1, C, HW), lambda b: (b, 0, 0)),      # x (flat)
                pl.BlockSpec((hidden, C), lambda b: (0, 0)),        # w1^T
                pl.BlockSpec((hidden, 1), lambda b: (0, 0)),        # b1 column
                pl.BlockSpec((C, hidden), lambda b: (0, 0)),        # w2^T
                pl.BlockSpec((C, 1), lambda b: (0, 0)),             # b2 column
                pl.BlockSpec((2 * HW, HW), lambda b: (0, 0)),       # conv matrix
                pl.BlockSpec(memory_space=pltpu.MemorySpace.SMEM),  # conv bias
            ],
            out_specs=pl.BlockSpec((1, C, HW), lambda b: (b, 0, 0)),
        ),
        compiler_params=pltpu.CompilerParams(
            dimension_semantics=("parallel",)),
    )(x_flat, w1t, b1c, w2t, b2c, conv_mat, conv_b)

    return out_flat.reshape(B, C, H, W)


# ----------------------------------------------------------------------------
# Pure-JAX reference (for sanity checking)
# ----------------------------------------------------------------------------
def cbam_ref(x, w1, b1, w2, b2, conv_w, conv_b):
    avg = jnp.mean(x, axis=(2, 3))                        # (B, C)
    mx = jnp.max(x, axis=(2, 3))                          # (B, C)

    def mlp(v):
        return jnp.maximum(v @ w1 + b1, 0.0) @ w2 + b2

    ca = jax.nn.sigmoid(mlp(avg) + mlp(mx))               # (B, C)
    x_ca = x * ca[:, :, None, None]

    avg_s = jnp.mean(x_ca, axis=1, keepdims=True)
    max_s = jnp.max(x_ca, axis=1, keepdims=True)
    s_in = jnp.concatenate([avg_s, max_s], axis=1)        # (B, 2, H, W)
    conv = jax.lax.conv_general_dilated(
        s_in, conv_w, window_strides=(1, 1), padding=[(3, 3), (3, 3)],
        dimension_numbers=("NCHW", "OIHW", "NCHW"))
    sa = jax.nn.sigmoid(conv + conv_b.reshape(1, 1, 1, 1))
    return x_ca * sa


# ----------------------------------------------------------------------------
# Main
# ----------------------------------------------------------------------------
if __name__ == "__main__":
    B, C, H, W = 2, 16, 16, 16
    reduction_ratio = 4
    hidden = C // reduction_ratio

    key = jax.random.PRNGKey(0)
    kx, k1, k2, k3, k4, k5, k6 = jax.random.split(key, 7)

    x = jax.random.normal(kx, (B, C, H, W), jnp.float32)

    # Channel-attention MLP params (Linear stored as (in, out) here).
    w1 = jax.random.normal(k1, (C, hidden), jnp.float32) * 0.1
    b1 = jax.random.normal(k2, (1, hidden), jnp.float32) * 0.1
    w2 = jax.random.normal(k3, (hidden, C), jnp.float32) * 0.1
    b2 = jax.random.normal(k4, (1, C), jnp.float32) * 0.1

    # Spatial-attention conv params: Conv2d(2, 1, kernel_size=7, padding=3).
    conv_w = jax.random.normal(k5, (1, 2, 7, 7), jnp.float32) * 0.1   # OIHW
    conv_b = jax.random.normal(k6, (1,), jnp.float32) * 0.1

    out = cbam_forward(x, w1, b1, w2, b2, conv_w, conv_b)
    out = jax.block_until_ready(out)

    ref = cbam_ref(x, w1, b1, w2, b2, conv_w, conv_b)
    np.testing.assert_allclose(np.asarray(out), np.asarray(ref),
                               rtol=1e-4, atol=1e-4)

    print("KERNEL_OK")
</pallas_src>

<mosaic_0001>
module attributes {stable_mosaic.version = 11 : i64} {
  func.func @cbam_kernel(%arg0: i32, %arg1: memref<1x16x256xf32, #tpu.memory_space<vmem>>, %arg2: memref<4x16xf32, #tpu.memory_space<vmem>>, %arg3: memref<4x1xf32, #tpu.memory_space<vmem>>, %arg4: memref<16x4xf32, #tpu.memory_space<vmem>>, %arg5: memref<16x1xf32, #tpu.memory_space<vmem>>, %arg6: memref<512x256xf32, #tpu.memory_space<vmem>>, %arg7: memref<1xf32, #tpu.memory_space<smem>>, %arg8: memref<1x16x256xf32, #tpu.memory_space<vmem>>) attributes {dimension_semantics = [#tpu.dimension_semantics<parallel>], iteration_bounds = array<i64: 2>, scalar_prefetch = 0 : i64, scratch_operands = 0 : i64, tpu.core_type = #tpu.core_type<tc>, window_params = [{transform_indices = @transform_0, window_bounds = array<i64: 1, 16, 256>}, {pipeline_mode = #tpu.pipeline_mode<synchronous>, transform_indices = @transform_1, window_bounds = array<i64: 4, 16>}, {pipeline_mode = #tpu.pipeline_mode<synchronous>, transform_indices = @transform_2, window_bounds = array<i64: 4, 1>}, {pipeline_mode = #tpu.pipeline_mode<synchronous>, transform_indices = @transform_3, window_bounds = array<i64: 16, 4>}, {pipeline_mode = #tpu.pipeline_mode<synchronous>, transform_indices = @transform_4, window_bounds = array<i64: 16, 1>}, {pipeline_mode = #tpu.pipeline_mode<synchronous>, transform_indices = @transform_5, window_bounds = array<i64: 512, 256>}, {transform_indices = @transform_6, window_bounds = array<i64: 1>}, {transform_indices = @transform_7, window_bounds = array<i64: 1, 16, 256>}]} {
    %c0 = arith.constant 0 : index
    %c0_0 = arith.constant 0 : index
    %c0_1 = arith.constant 0 : index
    %0 = vector.load %arg1[%c0, %c0_0, %c0_1] : memref<1x16x256xf32, #tpu.memory_space<vmem>>, vector<1x16x256xf32>
    %1 = vector.shape_cast %0 : vector<1x16x256xf32> to vector<16x256xf32>
    %cst = arith.constant dense<0.000000e+00> : vector<16xf32>
    %2 = vector.multi_reduction <add>, %1, %cst [1] : vector<16x256xf32> to vector<16xf32>
    %3 = vector.shape_cast %2 : vector<16xf32> to vector<16x1xf32>
    %cst_2 = arith.constant 3.906250e-03 : f32
    %4 = vector.broadcast %cst_2 : f32 to vector<16x1xf32>
    %5 = arith.mulf %3, %4 : vector<16x1xf32>
    %cst_3 = arith.constant dense<0xFF800000> : vector<16xf32>
    %6 = vector.multi_reduction <maximumf>, %1, %cst_3 [1] : vector<16x256xf32> to vector<16xf32>
    %7 = vector.shape_cast %6 : vector<16xf32> to vector<16x1xf32>
    %8 = tpu.concatenate %5, %7 in 1 : vector<16x1xf32>, vector<16x1xf32> -> vector<16x2xf32>
    %c0_4 = arith.constant 0 : index
    %c0_5 = arith.constant 0 : index
    %9 = vector.load %arg2[%c0_4, %c0_5] : memref<4x16xf32, #tpu.memory_space<vmem>>, vector<4x16xf32>
    %cst_6 = arith.constant dense<0.000000e+00> : vector<4x2xf32>
    %10 = tpu.matmul %9, %8, %cst_6 {dimension_numbers = #tpu.dot_dimension_numbers<[1], [0], [0], [1], [0, 0, 1, 1], [], []>} : vector<4x16xf32>, vector<16x2xf32>, vector<4x2xf32> -> vector<4x2xf32>
    %c0_7 = arith.constant 0 : index
    %c0_8 = arith.constant 0 : index
    %11 = vector.load %arg3[%c0_7, %c0_8] : memref<4x1xf32, #tpu.memory_space<vmem>>, vector<4x1xf32>
    %12 = vector.broadcast %11 : vector<4x1xf32> to vector<4x2xf32>
    %13 = arith.addf %10, %12 : vector<4x2xf32>
    %cst_9 = arith.constant 0.000000e+00 : f32
    %14 = vector.broadcast %cst_9 : f32 to vector<4x2xf32>
    %15 = arith.maximumf %13, %14 : vector<4x2xf32>
    %c0_10 = arith.constant 0 : index
    %c0_11 = arith.constant 0 : index
    %16 = vector.load %arg4[%c0_10, %c0_11] : memref<16x4xf32, #tpu.memory_space<vmem>>, vector<16x4xf32>
    %cst_12 = arith.constant dense<0.000000e+00> : vector<16x2xf32>
    %17 = tpu.matmul %16, %15, %cst_12 {dimension_numbers = #tpu.dot_dimension_numbers<[1], [0], [0], [1], [0, 0, 1, 1], [], []>} : vector<16x4xf32>, vector<4x2xf32>, vector<16x2xf32> -> vector<16x2xf32>
    %c0_13 = arith.constant 0 : index
    %c0_14 = arith.constant 0 : index
    %18 = vector.load %arg5[%c0_13, %c0_14] : memref<16x1xf32, #tpu.memory_space<vmem>>, vector<16x1xf32>
    %19 = vector.broadcast %18 : vector<16x1xf32> to vector<16x2xf32>
    %20 = arith.addf %17, %19 : vector<16x2xf32>
    %21 = vector.extract_strided_slice %20 {offsets = [0, 0], sizes = [16, 1], strides = [1, 1]} : vector<16x2xf32> to vector<16x1xf32>
    %22 = vector.extract_strided_slice %20 {offsets = [0, 1], sizes = [16, 1], strides = [1, 1]} : vector<16x2xf32> to vector<16x1xf32>
    %23 = arith.addf %21, %22 : vector<16x1xf32>
    %cst_15 = arith.constant 5.000000e-01 : f32
    %24 = vector.broadcast %cst_15 : f32 to vector<16x1xf32>
    %25 = arith.mulf %24, %23 : vector<16x1xf32>
    %26 = math.tanh %25 : vector<16x1xf32>
    %cst_16 = arith.constant 1.000000e+00 : f32
    %27 = vector.broadcast %cst_16 : f32 to vector<16x1xf32>
    %28 = arith.addf %26, %27 : vector<16x1xf32>
    %cst_17 = arith.constant 5.000000e-01 : f32
    %29 = vector.broadcast %cst_17 : f32 to vector<16x1xf32>
    %30 = arith.mulf %29, %28 : vector<16x1xf32>
    %31 = vector.broadcast %30 : vector<16x1xf32> to vector<16x256xf32>
    %32 = arith.mulf %1, %31 : vector<16x256xf32>
    %cst_18 = arith.constant dense<0.000000e+00> : vector<256xf32>
    %33 = vector.multi_reduction <add>, %32, %cst_18 [0] : vector<16x256xf32> to vector<256xf32>
    %34 = vector.shape_cast %33 : vector<256xf32> to vector<1x256xf32>
    %cst_19 = arith.constant 6.250000e-02 : f32
    %35 = vector.broadcast %cst_19 : f32 to vector<1x256xf32>
    %36 = arith.mulf %34, %35 : vector<1x256xf32>
    %cst_20 = arith.constant dense<0xFF800000> : vector<256xf32>
    %37 = vector.multi_reduction <maximumf>, %32, %cst_20 [0] : vector<16x256xf32> to vector<256xf32>
    %38 = vector.shape_cast %37 : vector<256xf32> to vector<1x256xf32>
    %39 = tpu.concatenate %36, %38 in 1 : vector<1x256xf32>, vector<1x256xf32> -> vector<1x512xf32>
    %c0_21 = arith.constant 0 : index
    %c0_22 = arith.constant 0 : index
    %40 = vector.load %arg6[%c0_21, %c0_22] : memref<512x256xf32, #tpu.memory_space<vmem>>, vector<512x256xf32>
    %cst_23 = arith.constant dense<0.000000e+00> : vector<1x256xf32>
    %41 = tpu.matmul %39, %40, %cst_23 {dimension_numbers = #tpu.dot_dimension_numbers<[1], [0], [0], [1], [0, 0, 1, 1], [], []>} : vector<1x512xf32>, vector<512x256xf32>, vector<1x256xf32> -> vector<1x256xf32>
    %c0_24 = arith.constant 0 : index
    %42 = memref.load %arg7[%c0_24] : memref<1xf32, #tpu.memory_space<smem>>
    %43 = vector.broadcast %42 : f32 to vector<1x256xf32>
    %44 = arith.addf %41, %43 : vector<1x256xf32>
    %cst_25 = arith.constant 5.000000e-01 : f32
    %45 = vector.broadcast %cst_25 : f32 to vector<1x256xf32>
    %46 = arith.mulf %45, %44 : vector<1x256xf32>
    %47 = math.tanh %46 : vector<1x256xf32>
    %cst_26 = arith.constant 1.000000e+00 : f32
    %48 = vector.broadcast %cst_26 : f32 to vector<1x256xf32>
    %49 = arith.addf %47, %48 : vector<1x256xf32>
    %cst_27 = arith.constant 5.000000e-01 : f32
    %50 = vector.broadcast %cst_27 : f32 to vector<1x256xf32>
    %51 = arith.mulf %50, %49 : vector<1x256xf32>
    %52 = vector.broadcast %51 : vector<1x256xf32> to vector<16x256xf32>
    %53 = arith.mulf %32, %52 : vector<16x256xf32>
    %c0_28 = arith.constant 0 : index
    %c0_29 = arith.constant 0 : index
    %c0_30 = arith.constant 0 : index
    %54 = vector.load %arg8[%c0_28, %c0_29, %c0_30] : memref<1x16x256xf32, #tpu.memory_space<vmem>>, vector<1x16x256xf32>
    %55 = vector.shape_cast %54 : vector<1x16x256xf32> to vector<16x256xf32>
    %56 = vector.shape_cast %53 : vector<16x256xf32> to vector<1x16x256xf32>
    tpu.vector_store %arg8[%c0_28, %c0_29, %c0_30], %56 {strides = array<i32>} : memref<1x16x256xf32, #tpu.memory_space<vmem>>, vector<1x16x256xf32>,
    return
  }
  func.func @transform_0(%arg0: i32) -> (i32, i32, i32) {
    %c0_i32 = arith.constant 0 : i32
    %c0_i32_0 = arith.constant 0 : i32
    %c0_i32_1 = arith.constant 0 : i32
    return %arg0, %c0_i32, %c0_i32_0 : i32, i32, i32
  }
  func.func @transform_1(%arg0: i32) -> (i32, i32) {
    %c0_i32 = arith.constant 0 : i32
    %c0_i32_0 = arith.constant 0 : i32
    %c0_i32_1 = arith.constant 0 : i32
    return %c0_i32, %c0_i32_0 : i32, i32
  }
  func.func @transform_2(%arg0: i32) -> (i32, i32) {
    %c0_i32 = arith.constant 0 : i32
    %c0_i32_0 = arith.constant 0 : i32
    %c0_i32_1 = arith.constant 0 : i32
    return %c0_i32, %c0_i32_0 : i32, i32
  }
  func.func @transform_3(%arg0: i32) -> (i32, i32) {
    %c0_i32 = arith.constant 0 : i32
    %c0_i32_0 = arith.constant 0 : i32
    %c0_i32_1 = arith.constant 0 : i32
    return %c0_i32, %c0_i32_0 : i32, i32
  }
  func.func @transform_4(%arg0: i32) -> (i32, i32) {
    %c0_i32 = arith.constant 0 : i32
    %c0_i32_0 = arith.constant 0 : i32
    %c0_i32_1 = arith.constant 0 : i32
    return %c0_i32, %c0_i32_0 : i32, i32
  }
  func.func @transform_5(%arg0: i32) -> (i32, i32) {
    %c0_i32 = arith.constant 0 : i32
    %c0_i32_0 = arith.constant 0 : i32
    %c0_i32_1 = arith.constant 0 : i32
    return %c0_i32, %c0_i32_0 : i32, i32
  }
  func.func @transform_6(%arg0: i32) -> i32 {
    %c0_i32 = arith.constant 0 : i32
    %c0_i32_0 = arith.constant 0 : i32
    return %c0_i32 : i32
  }
  func.func @transform_7(%arg0: i32) -> (i32, i32, i32) {
    %c0_i32 = arith.constant 0 : i32
    %c0_i32_0 = arith.constant 0 : i32
    %c0_i32_1 = arith.constant 0 : i32
    return %arg0, %c0_i32, %c0_i32_0 : i32, i32, i32
  }
}

</mosaic_0001>

<bundles_post_ra>
// kernel: cbam_forward.1
= control target key start
LH: loop header
LB: loop body
LE: loop exit
PB: predicated region body
PF: predicated region fallthrough
CT: control target
= control target key end

     0   :  { %s1145_s26 = smov 0   ;;  %s1619_s0 = inlined_call_operand.vmem [shape: f32[2,16,256], index: 0, kind: input, shape index: {}]   ;;  %s1620_s1 = inlined_call_operand.vmem [shape: f32[4,16], index: 1, kind: input, shape index: {}]   ;;  %s1621_s2 = inlined_call_operand.vmem [shape: f32[4,1], index: 2, kind: input, shape index: {}]   ;;  %s1622_s3 = inlined_call_operand.vmem [shape: f32[16,4], index: 3, kind: input, shape index: {}]   ;;  %s1623_s4 = inlined_call_operand.vmem [shape: f32[16,1], index: 4, kind: input, shape index: {}]   ;;  %s1624_s5 = inlined_call_operand.vmem [shape: f32[512,256], index: 5, kind: input, shape index: {}]   ;;  %s1625_s6 = inlined_call_operand.<no memory space> [shape: f32[1], index: 6, kind: input, shape index: {}]   ;;  %s1626_s7 = inlined_call_operand.vmem [shape: f32[2,16,256], index: 7, kind: output, shape index: {}]  }
   0x1   :  { %12 = sst [smem:[#allocation2]] %s1625_s6 }
   0x2 LB: > { %s896_s27 = sadd.s32 4294967295, %s1095_s26   ;;  %p900_p0 = scmp.ge.s32.totalorder %s1095_s26, 1  ;;  %s1095_s26 = sphi %s1145_s26, %s18_s26  }
   0x3   : > { %p238_p1 = scmp.lt.s32.totalorder %s1095_s26, 3 }
   0x5   : > { %p239_p2 = pnand %p900_p0, %p238_p1 }
   0x6   : > { %p270_p3 = scmp.lt.s32.totalorder (!%p239_p2), %s896_s27, 1  ;;  %v1097_v8 = vmov (!%p239_p2), 0.0|0.0   ;;  %vm1098_vm0 = vmmov (!%p239_p2), 0   ;;  %v1099_v9 = vmov (!%p239_p2), 0.0   ;;  %v302_v10 = vld [vmem:[%s1621_s2] sm:$0xf] (!%p239_p2) }
   0x7   : > { %242 = sbr.rel (%p239_p2) target bundleno = 1131 (0x46b), region = 48  ;;  %931 = vmatprep.subr.bf16.mxu0 (!%p239_p2), %v1097_v8  ;;  %923 = vmatprep.mubr.msk.f32.mxu0 (!%p239_p2), %vm1098_vm0, %v1099_v9  ;;  %v1100_v11 = vmov (!%p239_p2), 0   ;;  %vm298_vm1 = vcmask (!%p239_p2), 7168   ;;  %v301_v21 = vld [vmem:[%s1620_s1] sm:$0xf] (!%p239_p2)  ;;  %vm308_vm2 = vcmask (!%p239_p2), 130048  }
   0x8   : > { %1079 = vset.pattern.permute.xlu0 (!%p239_p2), %v1100_v11  ;;  %1080 = vset.pattern.permute.xlu1 (!%p239_p2), %v1100_v11  ;;  %v383_v22 = vld [vmem:[%s1622_s3] sm:$0xff] (!%p239_p2)  ;;  %vm397_vm3 = vcmask (!%p239_p2), 31744   ;;  %v386_v24 = vld [vmem:[%s1623_s4 + $0x8] sm:$0xff] (!%p239_p2)  ;;  %vm404_vm4 = vcmask (!%p239_p2), 1043456   ;;  %s1101_s20 = smov (!%p239_p2), 127   ;;  %v612_v38 = vld [vmem:[%s1624_s5 + $0x218] sm:$0xff] (!%p239_p2) }
   0x9   : > { %928 = vmatprep.mubr.msk.f32.mxu1 (!%p239_p2), %vm397_vm3, %v383_v22  ;;  %v385_v23 = vld [vmem:[%s1623_s4] sm:$0xff] (!%p239_p2)  ;;  %v384_v30 = vld [vmem:[%s1622_s3 + $0x8] sm:$0xff] (!%p239_p2)  ;;  %v611_v41 = vld [vmem:[%s1624_s5 + $0x210] sm:$0xff] (!%p239_p2)  ;;  %s673_s25 = sld [smem:[#allocation2]] (!%p239_p2) }
   0xa   : > { %v610_v37 = vld [vmem:[%s1624_s5 + $0x208] sm:$0xff] (!%p239_p2)  ;;  %v609_v39 = vld [vmem:[%s1624_s5 + $0x200] sm:$0xff] (!%p239_p2)  ;;  %v548_v43 = vld [vmem:[%s1624_s5 + $0x18] sm:$0xff] (!%p239_p2) }
   0xb   : > { %v998_v40 = vpack.c.bf16 (!%p239_p2), %v612_v38, %v610_v37  ;;  %v546_v42 = vld [vmem:[%s1624_s5 + $0x8] sm:$0xff] (!%p239_p2)  ;;  %v1000_v44 = vpack.c.bf16 (!%p239_p2), %v611_v41, %v609_v39  ;;  %v545_v46 = vld [vmem:[%s1624_s5] sm:$0xff] (!%p239_p2)  ;;  %v547_v47 = vld [vmem:[%s1624_s5 + $0x10] sm:$0xff] (!%p239_p2) }
   0xc   : > { %v934_v45 = vpack.c.bf16 (!%p239_p2), %v548_v43, %v546_v42  ;;  %v614_v48 = vld [vmem:[%s1624_s5 + $0x228] sm:$0xff] (!%p239_p2)  ;;  %v936_v49 = vpack.c.bf16 (!%p239_p2), %v547_v47, %v545_v46  ;;  %v616_v50 = vld [vmem:[%s1624_s5 + $0x238] sm:$0xff] (!%p239_p2)  ;;  %v613_v51 = vld [vmem:[%s1624_s5 + $0x220] sm:$0xff] (!%p239_p2) }
   0xd   : > { %v615_v52 = vld [vmem:[%s1624_s5 + $0x230] sm:$0xff] (!%p239_p2)  ;;  %v1002_v53 = vpack.c.bf16 (!%p239_p2), %v616_v50, %v614_v48  ;;  %v550_v55 = vld [vmem:[%s1624_s5 + $0x28] sm:$0xff] (!%p239_p2)  ;;  %v552_v56 = vld [vmem:[%s1624_s5 + $0x38] sm:$0xff] (!%p239_p2) }
   0xe   : > { %s1628_s27 = smov (!%p270_p3, %s896_s27), 1  ;;  %v1004_v54 = vpack.c.bf16 %v615_v52, %v613_v51  ;;  %v549_v57 = vld [vmem:[%s1624_s5 + $0x20] sm:$0xff]  ;;  %v938_v58 = vpack.c.bf16 %v552_v56, %v550_v55  ;;  %v551_v59 = vld [vmem:[%s1624_s5 + $0x30] sm:$0xff]  ;;  %v618_v60 = vld [vmem:[%s1624_s5 + $0x248] sm:$0xff] }
   0xf   : > { %s911_s6 = sshll.u32 %s1628_s27, 5  ;;  %v620_v61 = vld [vmem:[%s1624_s5 + $0x258] sm:$0xff]  ;;  %v940_v62 = vpack.c.bf16 %v551_v59, %v549_v57  ;;  %v553_v8 = vld [vmem:[%s1624_s5 + $0x40] sm:$0xff]  ;;  %v555_v9 = vld [vmem:[%s1624_s5 + $0x50] sm:$0xff] }
  0x10   : > { %s274_s30 = scalar_lea.vmem %s1619_s0, %s911_s6  ;;  %v1006_v63 = vpack.c.bf16 %v620_v61, %v618_v60  ;;  %v559_v22 = vld [vmem:[%s1624_s5 + $0x70] sm:$0xff]  ;;  %v630_v37 = vld [vmem:[%s1624_s5 + $0x2a8] sm:$0xff]  ;;  %v632_v38 = vld [vmem:[%s1624_s5 + $0x2b8] sm:$0xff] }
  0x11   : > { %v1161_v0 = vld [vmem:[%s274_s30] sm:$0xff]  ;;  %v1163_v1 = vld [vmem:[%s274_s30 + $0x8] sm:$0xff]  ;;  %v1165_v2 = vld [vmem:[%s274_s30 + $0x10] sm:$0xff]  ;;  %v1018_v43 = vpack.c.bf16 %v632_v38, %v630_v37 }
  0x12   : > { %v284_v3 = vadd.f32 %v1163_v1, %v1161_v0  ;;  %v292_v4 = vmax.f32 %v1161_v0, %v1163_v1  ;;  %v1171_v5 = vld [vmem:[%s274_s30 + $0x18] sm:$0xff]  ;;  %v566_v39 = vld [vmem:[%s1624_s5 + $0xa8] sm:$0xff]  ;;  %v565_v46 = vld [vmem:[%s1624_s5 + $0xa0] sm:$0xff]  ;;  %s279_s30 = scalar_lea.vmem %s1626_s7, %s911_s6 }
  0x13   : > { %v287_v6 = vadd.f32 %v1171_v5, %v1165_v2  ;;  %v295_v7 = vmax.f32 %v1165_v2, %v1171_v5  ;;  %v567_v48 = vld [vmem:[%s1624_s5 + $0xb0] sm:$0xff]  ;;  %v636_v50 = vld [vmem:[%s1624_s5 + $0x2d8] sm:$0xff]  ;;  %v570_v51 = vld [vmem:[%s1624_s5 + $0xc8] sm:$0xff] }
  0x14   : > { %285 = vadd.xlane.f32.xlu0 %v284_v3  ;;  %293 = vmax.xlane.f32.xlu1 %v292_v4  ;;  %v617_v3 = vld [vmem:[%s1624_s5 + $0x240] sm:$0xff]  ;;  %v619_v4 = vld [vmem:[%s1624_s5 + $0x250] sm:$0xff]  ;;  %v572_v52 = vld [vmem:[%s1624_s5 + $0xd8] sm:$0xff] }
  0x15   : > { %v633_v56 = vld [vmem:[%s1624_s5 + $0x2c0] sm:$0xff]  ;;  %v635_v57 = vld [vmem:[%s1624_s5 + $0x2d0] sm:$0xff]  ;;  %v958_v59 = vpack.c.bf16 %v572_v52, %v570_v51  ;;  %v638_v61 = vld [vmem:[%s1624_s5 + $0x2e8] sm:$0xff] }
  0x16   : > { %v571_v60 = vld [vmem:[%s1624_s5 + $0xd0] sm:$0xff] }
  0x17   : > { %v583_v38 = vld [vmem:[%s1624_s5 + $0x130] sm:$0xff] }
  0x18   : > { %288 = vadd.xlane.f32.xlu0 %v287_v6  ;;  %296 = vmax.xlane.f32.xlu1 %v295_v7  ;;  %v554_v6 = vld [vmem:[%s1624_s5 + $0x48] sm:$0xff]  ;;  %v556_v7 = vld [vmem:[%s1624_s5 + $0x58] sm:$0xff] }
  0x19   : > { %v942_v11 = vpack.c.bf16 %v556_v7, %v554_v6 }
  0x29   : > { %389 = vperm.xlu1 %1080, %v385_v23   ;;  %v626_v23 = vld [vmem:[%s1624_s5 + $0x288] sm:$0xff] }
  0x2d   : > { %394 = vperm.xlu1 %1080, %v386_v24   ;;  %v628_v24 = vld [vmem:[%s1624_s5 + $0x298] sm:$0xff] }
  0x2e   : > { %305 = vperm.xlu0 %1079, %v302_v10   ;;  %v1008_v10 = vpack.c.bf16 %v619_v4, %v617_v3  ;;  %v576_v3 = vld [vmem:[%s1624_s5 + $0xf8] sm:$0xff]  ;;  %v1024_v4 = vpack.c.bf16 %v635_v57, %v633_v56 }
  0xa1   : > { %v286_v12 = vpop.xlane.xlu0 %285  ;;  %v294_v13 = vpop.xlane.xlu1 %293 }
  0xa2   : > { %v290_v14 = vmul.f32 0.00390625, %v286_v12  ;;  %v622_v12 = vld [vmem:[%s1624_s5 + $0x268] sm:$0xff] }
  0xa4   : > { %v299_v18 = vsel %vm298_vm1, %v290_v14, %v294_v13  ;;  %v624_v13 = vld [vmem:[%s1624_s5 + $0x278] sm:$0xff]  ;;  %v621_v14 = vld [vmem:[%s1624_s5 + $0x260] sm:$0xff] }
  0xa5   : > { %v289_v15 = vpop.xlane.xlu0 %288  ;;  %v297_v16 = vpop.xlane.xlu1 %296 }
  0xa6   : > { %v291_v17 = vmul.f32 0.00390625, %v289_v15  ;;  %v944_v15 = vpack.c.bf16 %v555_v9, %v553_v8  ;;  %v637_v8 = vld [vmem:[%s1624_s5 + $0x2e0] sm:$0xff]  ;;  %v639_v9 = vld [vmem:[%s1624_s5 + $0x2f0] sm:$0xff] }
  0xa8   : > { %v300_v19 = vsel %vm298_vm1, %v291_v17, %v297_v16  ;;  %v1010_v16 = vpack.c.bf16 %v624_v13, %v622_v12  ;;  %v623_v17 = vld [vmem:[%s1624_s5 + $0x270] sm:$0xff]  ;;  %v642_v13 = vld [vmem:[%s1624_s5 + $0x308] sm:$0xff] }
  0xa9   : > { %v932_v20 = vpack.c.bf16 %v300_v19, %v299_v18  ;;  %v390_v31 = vpop.permute.xlu1 %389  ;;  %v558_v18 = vld [vmem:[%s1624_s5 + $0x68] sm:$0xff]  ;;  %v560_v19 = vld [vmem:[%s1624_s5 + $0x78] sm:$0xff]  ;;  %v575_v12 = vld [vmem:[%s1624_s5 + $0xf0] sm:$0xff] }
  0xab   : > { %933 = vmatpush3.bf16.msra.mxu0 %v932_v20  ;;  %v946_v20 = vpack.c.bf16 %v560_v19, %v558_v18 }
  0xac   : > { %935 = vmatprep.subr.bf16.mxu0 %v934_v45  ;;  %v631_v45 = vld [vmem:[%s1624_s5 + $0x2b0] sm:$0xff] }
  0xad   : > { %v306_v25 = vpop.permute.xlu0 %305  ;;  %v395_v35 = vpop.permute.xlu1 %394 }
  0xae   : > { %924 = vmatmul.mubr.msk.f32.vlgmr.msra.gmra.mrb[0].mxu0 %vm308_vm2, %v301_v21  ;;  %v557_v21 = vld [vmem:[%s1624_s5 + $0x60] sm:$0xff] }
  0xaf   : > { %937 = vmatpush1.bf16.msra.mxu0 %v936_v49  ;;  %v634_v49 = vld [vmem:[%s1624_s5 + $0x2c8] sm:$0xff] }
  0xb0   : > { %939 = vmatprep.subr.bf16.mxu0 %v938_v58  ;;  %v1022_v55 = vpack.c.bf16 %v636_v50, %v634_v49  ;;  %v569_v58 = vld [vmem:[%s1624_s5 + $0xc0] sm:$0xff] }
  0xb1   : > { %v960_v6 = vpack.c.bf16 %v571_v60, %v569_v58  ;;  %v585_v58 = vld [vmem:[%s1624_s5 + $0x140] sm:$0xff] }
  0xb3   : > { %941 = vmatpush1.bf16.msra.mxu0 %v940_v62  ;;  %v640_v62 = vld [vmem:[%s1624_s5 + $0x2f8] sm:$0xff] }
  0xb4   : > { %943 = vmatprep.subr.bf16.mxu0 %v942_v11  ;;  %v1026_v7 = vpack.c.bf16 %v640_v62, %v638_v61 }
  0xb7   : > { %945 = vmatpush1.bf16.msra.mxu0 %v944_v15  ;;  %v578_v15 = vld [vmem:[%s1624_s5 + $0x108] sm:$0xff] }
  0xb8   : > { %947 = vmatprep.subr.bf16.mxu0 %v946_v20  ;;  %v641_v20 = vld [vmem:[%s1624_s5 + $0x300] sm:$0xff] }
 0x181   : > { %v378_v26 = vpop.f32.mrb[0].mxu0 }
 0x182   : > { %v379_v27 = vadd.f32 %v378_v26, %v306_v25  ;;  %v925_v28 = vpop.f32.mrb[1].mxu0  ;;  %v1012_v25 = vpack.c.bf16 %v623_v17, %v621_v14  ;;  %v562_v26 = vld [vmem:[%s1624_s5 + $0x88] sm:$0xff]  ;;  %v644_v14 = vld [vmem:[%s1624_s5 + $0x318] sm:$0xff]  ;;  %v1028_v17 = vpack.c.bf16 %v639_v9, %v637_v8 }
 0x183   : > { %v948_v28 = vpack.c.bf16 %v559_v22, %v557_v21  ;;  %v1030_v19 = vpack.c.bf16 %v644_v14, %v642_v13  ;;  %v643_v21 = vld [vmem:[%s1624_s5 + $0x310] sm:$0xff]  ;;  %v577_v22 = vld [vmem:[%s1624_s5 + $0x100] sm:$0xff]  ;;  %v590_v8 = vld [vmem:[%s1624_s5 + $0x168] sm:$0xff] }
 0x184   : > { %v382_v29 = vmax.f32 %v379_v27, 0.0  ;;  %v564_v27 = vld [vmem:[%s1624_s5 + $0x98] sm:$0xff] }
 0x185   : > { %949 = vmatpush1.bf16.msra.mxu0 %v948_v28  ;;  %v584_v28 = vld [vmem:[%s1624_s5 + $0x138] sm:$0xff] }
 0x186   : > { %926 = vmatprep.subr.msk.mxu1 %vm404_vm4, %v382_v29  ;;  %v592_v9 = vld [vmem:[%s1624_s5 + $0x178] sm:$0xff] }
 0x187   : > { %927 = vmatpush3.msk.msra.mxu1 %vm404_vm4, %v382_v29  ;;  %v1014_v29 = vpack.c.bf16 %v628_v24, %v626_v23  ;;  %v579_v24 = vld [vmem:[%s1624_s5 + $0x110] sm:$0xff] }
 0x188   : > { %929 = vmatmul.mubr.msk.f32.vlgmr.msra.gmra.mrb[0].mxu1 %vm397_vm3, %v384_v30  ;;  %999 = vmatprep.subr.bf16.mxu1 %v998_v40  ;;  %v625_v30 = vld [vmem:[%s1624_s5 + $0x280] sm:$0xff]  ;;  %v568_v40 = vld [vmem:[%s1624_s5 + $0xb8] sm:$0xff] }
 0x189   : > { %1001 = vmatpush1.bf16.msra.mxu1 %v1000_v44  ;;  %v629_v44 = vld [vmem:[%s1624_s5 + $0x2a0] sm:$0xff]  ;;  %v954_v47 = vpack.c.bf16 %v568_v40, %v566_v39  ;;  %v650_v39 = vld [vmem:[%s1624_s5 + $0x348] sm:$0xff]  ;;  %v652_v40 = vld [vmem:[%s1624_s5 + $0x358] sm:$0xff] }
 0x18a   : > { %1003 = vmatprep.subr.bf16.mxu1 %v1002_v53  ;;  %v1020_v53 = vpack.c.bf16 %v631_v45, %v629_v44  ;;  %v1038_v45 = vpack.c.bf16 %v652_v40, %v650_v39  ;;  %v599_v39 = vld [vmem:[%s1624_s5 + $0x1b0] sm:$0xff] }
 0x18d   : > { %1005 = vmatpush1.bf16.msra.mxu1 %v1004_v54  ;;  %v956_v54 = vpack.c.bf16 %v567_v48, %v565_v46  ;;  %v649_v46 = vld [vmem:[%s1624_s5 + $0x340] sm:$0xff] }
 0x18e   : > { %1007 = vmatprep.subr.bf16.mxu1 %v1006_v63  ;;  %v574_v63 = vld [vmem:[%s1624_s5 + $0xe8] sm:$0xff] }
 0x18f   : > { %v962_v11 = vpack.c.bf16 %v576_v3, %v574_v63  ;;  %v653_v3 = vld [vmem:[%s1624_s5 + $0x360] sm:$0xff] }
 0x191   : > { %1009 = vmatpush1.bf16.msra.mxu1 %v1008_v10  ;;  %v573_v10 = vld [vmem:[%s1624_s5 + $0xe0] sm:$0xff] }
 0x192   : > { %1011 = vmatprep.subr.bf16.mxu1 %v1010_v16  ;;  %v580_v16 = vld [vmem:[%s1624_s5 + $0x118] sm:$0xff]  ;;  %v964_v18 = vpack.c.bf16 %v575_v12, %v573_v10  ;;  %v978_v10 = vpack.c.bf16 %v592_v9, %v590_v8  ;;  %v591_v12 = vld [vmem:[%s1624_s5 + $0x170] sm:$0xff] }
 0x193   : > { %v966_v23 = vpack.c.bf16 %v580_v16, %v578_v15  ;;  %v658_v15 = vld [vmem:[%s1624_s5 + $0x388] sm:$0xff]  ;;  %v660_v16 = vld [vmem:[%s1624_s5 + $0x398] sm:$0xff] }
 0x195   : > { %1013 = vmatpush1.bf16.msra.mxu1 %v1012_v25  ;;  %v646_v25 = vld [vmem:[%s1624_s5 + $0x328] sm:$0xff] }
 0x196   : > { %1015 = vmatprep.subr.bf16.mxu1 %v1014_v29  ;;  %v1032_v29 = vpack.c.bf16 %v643_v21, %v641_v20  ;;  %v594_v21 = vld [vmem:[%s1624_s5 + $0x188] sm:$0xff] }
 0x25b   : > { %v930_v32 = vpop.f32.mrb[0].mxu1 }
 0x25c   : > { %v474_v33 = vpop.f32.mrb[1].mxu1  ;;  %v1198_v36 = vadd.f32 %v930_v32, %v395_v35  ;;  %v561_v32 = vld [vmem:[%s1624_s5 + $0x80] sm:$0xff]  ;;  %v563_v35 = vld [vmem:[%s1624_s5 + $0x90] sm:$0xff] }
 0x25d   : > { %v1195_v34 = vadd.f32 %v474_v33, %v390_v31  ;;  %v627_v31 = vld [vmem:[%s1624_s5 + $0x290] sm:$0xff]  ;;  %v950_v33 = vpack.c.bf16 %v564_v27, %v562_v26  ;;  %v952_v42 = vpack.c.bf16 %v563_v35, %v561_v32  ;;  %v648_v26 = vld [vmem:[%s1624_s5 + $0x338] sm:$0xff]  ;;  %v582_v27 = vld [vmem:[%s1624_s5 + $0x128] sm:$0xff] }
 0x25e   : > { %v1016_v41 = vpack.c.bf16 %v627_v31, %v625_v30  ;;  %v968_v30 = vpack.c.bf16 %v579_v24, %v577_v22  ;;  %v1034_v31 = vpack.c.bf16 %v648_v26, %v646_v25  ;;  %v645_v32 = vld [vmem:[%s1624_s5 + $0x320] sm:$0xff]  ;;  %v970_v37 = vpack.c.bf16 %v584_v28, %v582_v27  ;;  %v596_v22 = vld [vmem:[%s1624_s5 + $0x198] sm:$0xff]  ;;  %v595_v25 = vld [vmem:[%s1624_s5 + $0x190] sm:$0xff] }
 0x25f   : > { %485 = vrot.lane.b32.xlu1 %v1195_v34, %s1101_s20  ;;  %951 = vmatprep.subr.bf16.mxu0 %v950_v33  ;;  %v647_v33 = vld [vmem:[%s1624_s5 + $0x330] sm:$0xff]  ;;  %v581_v35 = vld [vmem:[%s1624_s5 + $0x120] sm:$0xff]  ;;  %v662_v27 = vld [vmem:[%s1624_s5 + $0x3a8] sm:$0xff] }
 0x260   : > { %1017 = vmatpush1.bf16.msra.mxu1 %v1016_v41  ;;  %953 = vmatpush1.bf16.msra.mxu0 %v952_v42  ;;  %v586_v41 = vld [vmem:[%s1624_s5 + $0x148] sm:$0xff]  ;;  %v588_v42 = vld [vmem:[%s1624_s5 + $0x158] sm:$0xff]  ;;  %v972_v44 = vpack.c.bf16 %v583_v38, %v581_v35  ;;  %v593_v24 = vld [vmem:[%s1624_s5 + $0x180] sm:$0xff] }
 0x261   : > { %1019 = vmatprep.subr.bf16.mxu1 %v1018_v43  ;;  %955 = vmatprep.subr.bf16.mxu0 %v954_v47  ;;  %v1036_v43 = vpack.c.bf16 %v647_v33, %v645_v32  ;;  %v651_v47 = vld [vmem:[%s1624_s5 + $0x350] sm:$0xff]  ;;  %v974_v48 = vpack.c.bf16 %v588_v42, %v586_v41  ;;  %v984_v26 = vpack.c.bf16 %v595_v25, %v593_v24  ;;  %v664_v28 = vld [vmem:[%s1624_s5 + $0x3b8] sm:$0xff]  ;;  %v598_v33 = vld [vmem:[%s1624_s5 + $0x1a8] sm:$0xff] }
 0x262   : > { %v1040_v49 = vpack.c.bf16 %v651_v47, %v649_v46  ;;  %v600_v35 = vld [vmem:[%s1624_s5 + $0x1b8] sm:$0xff]  ;;  %v597_v38 = vld [vmem:[%s1624_s5 + $0x1a0] sm:$0xff]  ;;  %v666_v41 = vld [vmem:[%s1624_s5 + $0x3c8] sm:$0xff] }
 0x263   : > { %487 = vrot.lane.b32.xlu1 %v1198_v36, %s1101_s20  ;;  %v988_v40 = vpack.c.bf16 %v599_v39, %v597_v38  ;;  %v668_v42 = vld [vmem:[%s1624_s5 + $0x3d8] sm:$0xff]  ;;  %v602_v47 = vld [vmem:[%s1624_s5 + $0x1c8] sm:$0xff]  ;;  %v674_v38 = vstv %s673_s25 }
 0x264   : > { %1021 = vmatpush1.bf16.msra.mxu1 %v1020_v53  ;;  %957 = vmatpush1.bf16.msra.mxu0 %v956_v54 }
 0x265   : > { %1023 = vmatprep.subr.bf16.mxu1 %v1022_v55  ;;  %959 = vmatprep.subr.bf16.mxu0 %v958_v59  ;;  %v587_v59 = vld [vmem:[%s1624_s5 + $0x150] sm:$0xff] }
 0x266   : > { %v976_v61 = vpack.c.bf16 %v587_v59, %v585_v58  ;;  %v606_v58 = vld [vmem:[%s1624_s5 + $0x1e8] sm:$0xff]  ;;  %v608_v59 = vld [vmem:[%s1624_s5 + $0x1f8] sm:$0xff] }
 0x268   : > { %1025 = vmatpush1.bf16.msra.mxu1 %v1024_v4  ;;  %961 = vmatpush1.bf16.msra.mxu0 %v960_v6  ;;  %v655_v4 = vld [vmem:[%s1624_s5 + $0x370] sm:$0xff] }
 0x269   : > { %1027 = vmatprep.subr.bf16.mxu1 %v1026_v7  ;;  %963 = vmatprep.subr.bf16.mxu0 %v962_v11  ;;  %v1044_v7 = vpack.c.bf16 %v655_v4, %v653_v3  ;;  %v589_v11 = vld [vmem:[%s1624_s5 + $0x160] sm:$0xff] }
 0x26a   : > { %v980_v14 = vpack.c.bf16 %v591_v12, %v589_v11 }
 0x26c   : > { %1029 = vmatpush1.bf16.msra.mxu1 %v1028_v17  ;;  %965 = vmatpush1.bf16.msra.mxu0 %v964_v18  ;;  %v1046_v17 = vpack.c.bf16 %v660_v16, %v658_v15  ;;  %v657_v18 = vld [vmem:[%s1624_s5 + $0x380] sm:$0xff] }
 0x26d   : > { %1031 = vmatprep.subr.bf16.mxu1 %v1030_v19  ;;  %967 = vmatprep.subr.bf16.mxu0 %v966_v23  ;;  %v659_v19 = vld [vmem:[%s1624_s5 + $0x390] sm:$0xff]  ;;  %v982_v23 = vpack.c.bf16 %v596_v22, %v594_v21 }
 0x26e   : > { %v1048_v20 = vpack.c.bf16 %v659_v19, %v657_v18 }
 0x270   : > { %1033 = vmatpush1.bf16.msra.mxu1 %v1032_v29  ;;  %969 = vmatpush1.bf16.msra.mxu0 %v968_v30  ;;  %v1050_v29 = vpack.c.bf16 %v664_v28, %v662_v27  ;;  %v661_v30 = vld [vmem:[%s1624_s5 + $0x3a0] sm:$0xff] }
 0x271   : > { %1035 = vmatprep.subr.bf16.mxu1 %v1034_v31  ;;  %971 = vmatprep.subr.bf16.mxu0 %v970_v37  ;;  %v663_v31 = vld [vmem:[%s1624_s5 + $0x3b0] sm:$0xff]  ;;  %v986_v37 = vpack.c.bf16 %v600_v35, %v598_v33 }
 0x272   : > { %v1052_v32 = vpack.c.bf16 %v663_v31, %v661_v30 }
 0x274   : > { %1037 = vmatpush1.bf16.msra.mxu1 %v1036_v43  ;;  %973 = vmatpush1.bf16.msra.mxu0 %v972_v44  ;;  %v1054_v43 = vpack.c.bf16 %v668_v42, %v666_v41  ;;  %v665_v44 = vld [vmem:[%s1624_s5 + $0x3c0] sm:$0xff] }
 0x275   : > { %1039 = vmatprep.subr.bf16.mxu1 %v1038_v45  ;;  %975 = vmatprep.subr.bf16.mxu0 %v974_v48  ;;  %v667_v45 = vld [vmem:[%s1624_s5 + $0x3d0] sm:$0xff]  ;;  %v604_v48 = vld [vmem:[%s1624_s5 + $0x1d8] sm:$0xff] }
 0x276   : > { %v1056_v46 = vpack.c.bf16 %v667_v45, %v665_v44 }
 0x278   : > { %1041 = vmatpush1.bf16.msra.mxu1 %v1040_v49  ;;  %977 = vmatpush1.bf16.msra.mxu0 %v976_v61  ;;  %v990_v49 = vpack.c.bf16 %v604_v48, %v602_v47  ;;  %v994_v61 = vpack.c.bf16 %v608_v59, %v606_v58  ;;  %v825_v48 = vlaneseq }
 0x279   : > { %979 = vmatprep.subr.bf16.mxu0 %v978_v10 }
 0x27c   : > { %981 = vmatpush1.bf16.msra.mxu0 %v980_v14 }
 0x27d   : > { %983 = vmatprep.subr.bf16.mxu0 %v982_v23 }
 0x280   : > { %985 = vmatpush1.bf16.msra.mxu0 %v984_v26 }
 0x281   : > { %987 = vmatprep.subr.bf16.mxu0 %v986_v37 }
 0x284   : > { %989 = vmatpush1.bf16.msra.mxu0 %v988_v40 }
 0x285   : > { %991 = vmatprep.subr.bf16.mxu0 %v990_v49  ;;  %v826_v49 = vshrl.u32 %v825_v48, 7 }
 0x2d1   : > { %v486_v50 = vpop.permute.xlu1 %485 }
 0x2d2   : > { %v491_v51 = vadd.f32 %v486_v50, %v1195_v34  ;;  %v654_v34 = vld [vmem:[%s1624_s5 + $0x368] sm:$0xff]  ;;  %v601_v50 = vld [vmem:[%s1624_s5 + $0x1c0] sm:$0xff] }
 0x2d4   : > { %v493_v52 = vmul.f32 0.5, %v491_v51  ;;  %v603_v51 = vld [vmem:[%s1624_s5 + $0x1d0] sm:$0xff] }
 0x2d5   : > { %v488_v53 = vpop.permute.xlu1 %487 }
 0x2d6   : > { %1081 = vtanh.f32 %v493_v52  ;;  %v492_v54 = vadd.f32 %v488_v53, %v1198_v36  ;;  %v656_v36 = vld [vmem:[%s1624_s5 + $0x378] sm:$0xff]  ;;  %v992_v52 = vpack.c.bf16 %v603_v51, %v601_v50  ;;  %v670_v53 = vld [vmem:[%s1624_s5 + $0x3e8] sm:$0xff] }
 0x2d7   : > { %v1042_v63 = vpack.c.bf16 %v656_v36, %v654_v34  ;;  %v605_v34 = vld [vmem:[%s1624_s5 + $0x1e0] sm:$0xff]  ;;  %v607_v36 = vld [vmem:[%s1624_s5 + $0x1f0] sm:$0xff] }
 0x2d8   : > { %v494_v55 = vmul.f32 0.5, %v492_v54  ;;  %v672_v54 = vld [vmem:[%s1624_s5 + $0x3f8] sm:$0xff]  ;;  %993 = vmatpush1.bf16.msra.mxu0 %v992_v52 }
 0x2d9   : > { %1043 = vmatprep.subr.bf16.mxu1 %v1042_v63  ;;  %995 = vmatprep.subr.bf16.mxu0 %v994_v61 }
 0x2da   : > { %1083 = vtanh.f32 %v494_v55  ;;  %1045 = vmatpush1.bf16.msra.mxu1 %v1044_v7  ;;  %v669_v55 = vld [vmem:[%s1624_s5 + $0x3e0] sm:$0xff] }
 0x2db   : > { %1047 = vmatprep.subr.bf16.mxu1 %v1046_v17 }
 0x2de   : > { %1049 = vmatpush1.bf16.msra.mxu1 %v1048_v20 }
 0x2df   : > { %1051 = vmatprep.subr.bf16.mxu1 %v1050_v29 }
 0x2e0   : > { %v1082_v56 = vpop.eup %1081 }
 0x2e1   : > { %v497_v57 = vadd.f32 1.0, %v1082_v56  ;;  %v1058_v56 = vpack.c.bf16 %v672_v54, %v670_v53  ;;  %v827_v53 = vsub.s32 0, %v826_v49 }
 0x2e2   : > { %1053 = vmatpush1.bf16.msra.mxu1 %v1052_v32 }
 0x2e3   : > { %v499_v60 = vmul.f32 0.5, %v497_v57  ;;  %1055 = vmatprep.subr.bf16.mxu1 %v1054_v43  ;;  %v671_v57 = vld [vmem:[%s1624_s5 + $0x3f0] sm:$0xff] }
 0x2e4   : > { %v1084_v62 = vpop.eup %1083 }
 0x2e5   : > { %v498_v6 = vadd.f32 1.0, %v1084_v62  ;;  %503 = vperm.xlu1 %1080, %v499_v60   ;;  %v1060_v60 = vpack.c.bf16 %v671_v57, %v669_v55  ;;  %v996_v62 = vpack.c.bf16 %v607_v36, %v605_v34 }
 0x2e6   : > { %1057 = vmatpush1.bf16.msra.mxu1 %v1056_v46 }
 0x2e7   : > { %v500_v13 = vmul.f32 0.5, %v498_v6  ;;  %1059 = vmatprep.subr.bf16.mxu1 %v1058_v56  ;;  %997 = vmatpush1.bf16.msra.mxu0 %v996_v62 }
 0x2e9   : > { %508 = vperm.xlu1 %1080, %v500_v13  }
 0x2ea   : > { %1061 = vmatpush1.bf16.msra.mxu1 %v1060_v60 }
 0x364   : > { %v504_v63 = vpop.permute.xlu1 %503 }
 0x365   : > { %v1588_v4 = vmul.f32 %v504_v63, %v1161_v0  ;;  %v1591_v6 = vmul.f32 %v504_v63, %v1163_v1 }
 0x368   : > { %v509_v3 = vpop.permute.xlu1 %508 }
 0x369   : > { %v1594_v7 = vmul.f32 %v509_v3, %v1165_v2  ;;  %v1597_v8 = vmul.f32 %v509_v3, %v1171_v5 }
 0x36b   : > { %v515_v9 = vadd.f32 %v1594_v7, %v1588_v4  ;;  %v522_v10 = vadd.f32 %v1597_v8, %v1591_v6  ;;  %v531_v11 = vmax.f32 %v1588_v4, %v1594_v7  ;;  %v538_v0 = vmax.f32 %v1591_v6, %v1597_v8 }
 0x36d   : > { %v516_v1 = vrot.slane %v515_v9, 4  ;;  %v523_v12 = vrot.slane %v522_v10, 4  ;;  %v532_v13 = vrot.slane %v531_v11, 4  ;;  %v539_v2 = vrot.slane %v538_v0, 4 }
 0x36f   : > { %v517_v14 = vadd.f32 %v516_v1, %v515_v9  ;;  %v524_v15 = vadd.f32 %v523_v12, %v522_v10  ;;  %v533_v5 = vmax.f32 %v531_v11, %v532_v13  ;;  %v540_v16 = vmax.f32 %v538_v0, %v539_v2 }
 0x371   : > { %v518_v17 = vrot.slane %v517_v14, 2  ;;  %v534_v18 = vrot.slane %v533_v5, 2  ;;  %v541_v19 = vrot.slane %v540_v16, 2  ;;  %v525_v20 = vrot.slane %v524_v15, 2 }
 0x373   : > { %v519_v21 = vadd.f32 %v518_v17, %v517_v14  ;;  %v535_v22 = vmax.f32 %v533_v5, %v534_v18  ;;  %v542_v23 = vmax.f32 %v540_v16, %v541_v19  ;;  %v526_v24 = vadd.f32 %v525_v20, %v524_v15 }
 0x375   : > { %v543_v25 = vrot.slane %v542_v23, 1  ;;  %v536_v26 = vrot.slane %v535_v22, 1  ;;  %v527_v27 = vrot.slane %v526_v24, 1  ;;  %v520_v28 = vrot.slane %v519_v21, 1 }
 0x377   : > { %v544_v29 = vmax.f32 %v542_v23, %v543_v25  ;;  %v537_v30 = vmax.f32 %v535_v22, %v536_v26  ;;  %v528_v31 = vadd.f32 %v527_v27, %v526_v24  ;;  %v521_v32 = vadd.f32 %v520_v28, %v519_v21 }
 0x379   : > { %810 = vmatprep.mubr.f32.mxu1 %v544_v29  ;;  %v530_v33 = vmul.f32 0.0625, %v528_v31  ;;  %v529_v35 = vmul.f32 0.0625, %v521_v32 }
 0x37a   : > { %811 = vmatmul.mubr.f32.vlgmr.msra.gmra.mrb[2].mxu1 %v537_v30 }
 0x37b   : > { %739 = vmatprep.mubr.f32.mxu0 %v530_v33 }
 0x37c   : > { %740 = vmatmul.mubr.f32.vlgmr.msra.gmra.mrb[2].mxu0 %v529_v35 }
 0x44d   : > { %v812_v37 = vpop.f32.mrb[2].mxu1 }
 0x44e   : > { %v814_v39 = vpop.f32.mrb[3].mxu1 }
 0x44f   : > { %v741_v40 = vpop.f32.mrb[2].mxu0 }
 0x450   : > { %v742_v41 = vadd.f32 %v741_v40, %v674_v38  ;;  %v743_v42 = vpop.f32.mrb[3].mxu0 }
 0x451   : > { %v744_v43 = vadd.f32 %v743_v42, %v674_v38 }
 0x452   : > { %v813_v44 = vadd.f32 %v812_v37, %v742_v41 }
 0x453   : > { %v815_v45 = vadd.f32 %v814_v39, %v744_v43 }
 0x454   : > { %v817_v46 = vmul.f32 0.5, %v813_v44 }
 0x455   : > { %v818_v47 = vmul.f32 0.5, %v815_v45 }
 0x456   : > { %1085 = vtanh.f32 %v817_v46 }
 0x457   : > { %1087 = vtanh.f32 %v818_v47 }
 0x460   : > { %v1086_v50 = vpop.eup %1085 }
 0x461   : > { %v1088_v51 = vpop.eup %1087  ;;  %v821_v52 = vadd.f32 1.0, %v1086_v50 }
 0x462   : > { %v822_v54 = vadd.f32 1.0, %v1088_v51 }
 0x463   : > { %v823_v55 = vmul.f32 0.5, %v821_v52 }
 0x464   : > { %v824_v56 = vmul.f32 0.5, %v822_v54 }
 0x465   : > { %v828_v57 = vrot.slane %v823_v55, %v827_v53 }
 0x466   : > { %v832_v58 = vrot.slane %v824_v56, %v827_v53 }
 0x467   : > { %v833_v59 = vmul.f32 %v828_v57, %v1588_v4  ;;  %v835_v60 = vmul.f32 %v828_v57, %v1594_v7 }
 0x468   : > { %v834_v61 = vmul.f32 %v832_v58, %v1591_v6  ;;  %v836_v34 = vmul.f32 %v832_v58, %v1597_v8 }
 0x469   : > { %837 = vst [vmem:[%s279_s30] sm:$0xff] %v833_v59  ;;  %839 = vst [vmem:[%s279_s30 + $0x10] sm:$0xff] %v835_v60 }
 0x46a   : > { %838 = vst [vmem:[%s279_s30 + $0x8] sm:$0xff] %v834_v61  ;;  %840 = vst [vmem:[%s279_s30 + $0x18] sm:$0xff] %v836_v34 }
 0x46b PF: > { %s18_s26 = sadd.s32 1, %s1095_s26  }
 0x46c   : > { %p15_p4 = scmp.ge.s32.totalorder %s18_s26, 4  }
 0x46e   :  { %17 = sbr.rel (!%p15_p4) target bundleno = 2 (0x2), region = 78 }

</bundles_post_ra>
